<compile_context>
chip_gen: v7x
topology: tpu7x:2x2x1
jax: 0.10.0
libtpu: 0.0.40
codegen_flags: <defaults>
</compile_context>

<pallas_src>
import functools

import jax
import jax.numpy as jnp
from jax.experimental import pallas as pl
from jax.experimental.pallas import tpu as pltpu


# ----------------------------------------------------------------------------
# Kernel
# ----------------------------------------------------------------------------
def _qwen_mlp_kernel(x_ref, w12_ref, wc_ref, o_ref, acc_ref):
    """One (M tile, F tile) step of the SwiGLU MLP.

    x_ref   : (tile_m, H)            activations tile (resident across F)
    w12_ref : (H, 2*tile_f)          packed [W1^T tile | W2^T tile]
    wc_ref  : (tile_f, H)            Wc^T tile (down projection)
    o_ref   : (tile_m, H)            output tile (written at last F step)
    acc_ref : (tile_m, H) f32 VMEM   accumulator, resident across F steps
    """
    f = pl.program_id(1)

    @pl.when(f == 0)
    def _():
        acc_ref[...] = jnp.zeros_like(acc_ref)

    tile_f = wc_ref.shape[0]

    # Fused gate+up projection: one MXU matmul, f32 accumulation.
    a = jnp.dot(x_ref[...], w12_ref[...], preferred_element_type=jnp.float32)
    a1 = a[:, :tile_f]          # gate:  x @ W1^T (this F tile)
    a2 = a[:, tile_f:]          # up:    x @ W2^T (this F tile)

    # SiLU(a2) = a2 * sigmoid(a2) in f32 (VPU + EUP), gated by a1.
    inter = (a1 * a2 * jax.nn.sigmoid(a2)).astype(x_ref.dtype)

    # Partial down projection, accumulated over F tiles in f32.
    acc_ref[...] += jnp.dot(inter, wc_ref[...],
                            preferred_element_type=jnp.float32)

    @pl.when(f == pl.num_programs(1) - 1)
    def _():
        o_ref[...] = acc_ref[...].astype(o_ref.dtype)


# ----------------------------------------------------------------------------
# Weight packing (do ONCE, outside the per-step forward)
# ----------------------------------------------------------------------------
def choose_tile_f(F):
    """Largest F tile such that F % tile_f == 0 and 2*tile_f % 128 == 0."""
    for cand in (2048, 1024, 512, 256, 128, 64):
        if F % cand == 0:
            return cand
    return F  # tiny / odd shapes: single F tile (block == full array)


def pack_qwen_mlp_weights(w1, w2, c_proj, *, tile_f):
    """w1, w2: (F, H) nn.Linear layout; c_proj: (H, F).

    Returns:
      w12 : (H, 2*F)  per-F-tile packed [W1^T tile | W2^T tile] columns
      wc_t: (F, H)    Wc^T
    """
    F, H = w1.shape
    assert F % tile_f == 0, "tile_f must divide F"
    nf = F // tile_f
    w1_t = w1.T.reshape(H, nf, tile_f)
    w2_t = w2.T.reshape(H, nf, tile_f)
    w12 = jnp.stack([w1_t, w2_t], axis=2).reshape(H, 2 * F)
    wc_t = c_proj.T
    return w12, wc_t


# ----------------------------------------------------------------------------
# Wrapper
# ----------------------------------------------------------------------------
def _round_up(x, m):
    return ((x + m - 1) // m) * m


_VMEM_BUDGET = 40 * 1024 * 1024   # leave headroom below v7x's 64 MiB VMEM/TC


def _choose_tile_m(M, H, tile_f, itemsize, budget=_VMEM_BUDGET):
    """Largest tile_m (mult of 8, <=512) whose working set fits the budget."""
    # Double-buffered weight tiles: w12 (H, 2*tile_f) + wc (tile_f, H).
    w_bytes = 2 * (H * 2 * tile_f + tile_f * H) * itemsize
    m_cap = _round_up(M, 8)
    for tm in (512, 256, 128, 64, 32, 16, 8):
        if tm > m_cap:
            continue
        x_bytes = 2 * tm * H * itemsize        # double-buffered input tile
        o_bytes = 2 * tm * H * itemsize        # double-buffered output tile
        acc_bytes = tm * H * 4                 # f32 accumulator scratch
        if w_bytes + x_bytes + o_bytes + acc_bytes <= budget:
            return tm
    return 8


def qwen_mlp(hidden_states, w12, wc_t, *, tile_f, tile_m=None):
    """
    hidden_states: (B, S, H)
    w12:           (H, 2*F)  from pack_qwen_mlp_weights (same tile_f!)
    wc_t:          (F, H)
    returns        (B, S, H)
    """
    B, S, H = hidden_states.shape
    F, _ = wc_t.shape
    assert w12.shape == (H, 2 * F)
    assert F % tile_f == 0

    M = B * S
    itemsize = jnp.dtype(hidden_states.dtype).itemsize
    if tile_m is None:
        tile_m = _choose_tile_m(M, H, tile_f, itemsize)
    tile_m = min(tile_m, _round_up(M, 8))
    M_pad = _round_up(M, tile_m)

    x2d = hidden_states.reshape(M, H)
    if M_pad != M:
        x2d = jnp.pad(x2d, ((0, M_pad - M), (0, 0)))

    num_m_tiles = M_pad // tile_m
    grid = (num_m_tiles, F // tile_f)

    cost = pl.CostEstimate(
        flops=6 * M_pad * H * F,                                  # 2 matmul phases
        transcendentals=M_pad * F,                                # sigmoid
        bytes_accessed=(2 * M_pad * H + 3 * H * F * num_m_tiles) * itemsize,
    )

    out2d = pl.pallas_call(
        _qwen_mlp_kernel,
        out_shape=jax.ShapeDtypeStruct((M_pad, H), hidden_states.dtype),
        grid_spec=pltpu.PrefetchScalarGridSpec(
            num_scalar_prefetch=0,
            grid=grid,
            in_specs=[
                # activations tile: resident across the F (reduction) axis
                pl.BlockSpec((tile_m, H), lambda i, f: (i, 0)),
                # packed gate+up weight tile, streamed over F
                pl.BlockSpec((H, 2 * tile_f), lambda i, f: (0, f)),
                # down-projection weight tile, streamed over F
                pl.BlockSpec((tile_f, H), lambda i, f: (f, 0)),
            ],
            out_specs=pl.BlockSpec((tile_m, H), lambda i, f: (i, 0)),
            scratch_shapes=[pltpu.VMEM((tile_m, H), jnp.float32)],
        ),
        compiler_params=pltpu.CompilerParams(
            dimension_semantics=("parallel", "arbitrary"),
            # Lifts the 16/32 MiB default scoped limits (v5e/v6e/v7x) while
            # staying under v7x's 64 MiB physical VMEM per TensorCore.
            vmem_limit_bytes=48 * 1024 * 1024,
        ),
        cost_estimate=cost,
    )(x2d, w12, wc_t)

    if M_pad != M:
        out2d = out2d[:M]
    return out2d.reshape(B, S, H)


# ----------------------------------------------------------------------------
# Reference + test
# ----------------------------------------------------------------------------
def _reference(hidden_states, w1, w2, c_proj):
    a1 = hidden_states @ w1.T
    a2 = hidden_states @ w2.T
    inter = a1 * (a2 * jax.nn.sigmoid(a2))
    return inter @ c_proj.T


if __name__ == "__main__":
    # Small, module-consistent shapes:
    #   batch=2, seq=8, hidden_size=32, ffn_hidden_size=128 -> F = 64
    B, S, H = 2, 8, 32
    FFN = 128
    F_DIM = FFN // 2

    key = jax.random.PRNGKey(0)
    kx, k1, k2, k3 = jax.random.split(key, 4)

    x = jax.random.normal(kx, (B, S, H), dtype=jnp.float32)
    # nn.Linear-style deterministic init (uniform +/- 1/sqrt(fan_in)), no bias.
    w1 = jax.random.uniform(k1, (F_DIM, H), jnp.float32,
                            -1.0 / (H ** 0.5), 1.0 / (H ** 0.5))
    w2 = jax.random.uniform(k2, (F_DIM, H), jnp.float32,
                            -1.0 / (H ** 0.5), 1.0 / (H ** 0.5))
    c_proj = jax.random.uniform(k3, (H, F_DIM), jnp.float32,
                                -1.0 / (F_DIM ** 0.5), 1.0 / (F_DIM ** 0.5))

    # Pack weights once (outside the hot path).
    tile_f = choose_tile_f(F_DIM)
    w12, wc_t = pack_qwen_mlp_weights(w1, w2, c_proj, tile_f=tile_f)

    run = jax.jit(functools.partial(qwen_mlp, tile_f=tile_f))
    out = run(x, w12, wc_t)
    out = jax.block_until_ready(out)

    ref = _reference(x, w1, w2, c_proj)
    assert out.shape == (B, S, H)
    assert jnp.allclose(out, ref, atol=1e-5, rtol=1e-5), "mismatch vs reference"

    print("KERNEL_OK")
</pallas_src>

<mosaic_0001>
module attributes {stable_mosaic.version = 11 : i64} {
  func.func @_qwen_mlp_kernel(%arg0: i32, %arg1: i32, %arg2: memref<16x32xf32, #tpu.memory_space<vmem>>, %arg3: memref<32x128xf32, #tpu.memory_space<vmem>>, %arg4: memref<64x32xf32, #tpu.memory_space<vmem>>, %arg5: memref<16x32xf32, #tpu.memory_space<vmem>>, %arg6: memref<16x32xf32, #tpu.memory_space<vmem>>) attributes {dimension_semantics = [#tpu.dimension_semantics<parallel>, #tpu.dimension_semantics<arbitrary>], iteration_bounds = array<i64: 1, 1>, scalar_prefetch = 0 : i64, scratch_operands = 1 : i64, tpu.core_type = #tpu.core_type<tc>, window_params = [{transform_indices = @transform_0, window_bounds = array<i64: 16, 32>}, {transform_indices = @transform_1, window_bounds = array<i64: 32, 128>}, {transform_indices = @transform_2, window_bounds = array<i64: 64, 32>}, {transform_indices = @transform_3, window_bounds = array<i64: 16, 32>}]} {
    %c0_i32 = arith.constant 0 : i32
    %0 = arith.cmpi eq, %arg1, %c0_i32 : i32
    %1 = arith.extui %0 : i1 to i32
    %c0_i32_0 = arith.constant 0 : i32
    %2 = arith.cmpi ne, %1, %c0_i32_0 : i32
    scf.if %2 {
      %cst_14 = arith.constant 0.000000e+00 : f32
      %23 = vector.broadcast %cst_14 : f32 to vector<16x32xf32>
      %c0_15 = arith.constant 0 : index
      %c0_16 = arith.constant 0 : index
      %24 = vector.load %arg6[%c0_15, %c0_16] : memref<16x32xf32, #tpu.memory_space<vmem>>, vector<16x32xf32>
      tpu.vector_store %arg6[%c0_15, %c0_16], %23 {strides = array<i32>} : memref<16x32xf32, #tpu.memory_space<vmem>>, vector<16x32xf32>,
    } else {
    }
    %c0 = arith.constant 0 : index
    %c0_1 = arith.constant 0 : index
    %3 = vector.load %arg2[%c0, %c0_1] : memref<16x32xf32, #tpu.memory_space<vmem>>, vector<16x32xf32>
    %c0_2 = arith.constant 0 : index
    %c0_3 = arith.constant 0 : index
    %4 = vector.load %arg3[%c0_2, %c0_3] : memref<32x128xf32, #tpu.memory_space<vmem>>, vector<32x128xf32>
    %cst = arith.constant dense<0.000000e+00> : vector<16x128xf32>
    %5 = tpu.matmul %3, %4, %cst {dimension_numbers = #tpu.dot_dimension_numbers<[1], [0], [0], [1], [0, 0, 1, 1], [], []>} : vector<16x32xf32>, vector<32x128xf32>, vector<16x128xf32> -> vector<16x128xf32>
    %6 = vector.extract_strided_slice %5 {offsets = [0, 0], sizes = [16, 64], strides = [1, 1]} : vector<16x128xf32> to vector<16x64xf32>
    %7 = vector.extract_strided_slice %5 {offsets = [0, 64], sizes = [16, 64], strides = [1, 1]} : vector<16x128xf32> to vector<16x64xf32>
    %8 = arith.mulf %6, %7 : vector<16x64xf32>
    %9 = arith.negf %7 : vector<16x64xf32>
    %10 = math.exp %9 : vector<16x64xf32>
    %cst_4 = arith.constant 1.000000e+00 : f32
    %11 = vector.broadcast %cst_4 : f32 to vector<16x64xf32>
    %12 = arith.addf %11, %10 : vector<16x64xf32>
    %13 = arith.divf %11, %12 : vector<16x64xf32>
    %14 = arith.mulf %8, %13 : vector<16x64xf32>
    %c0_5 = arith.constant 0 : index
    %c0_6 = arith.constant 0 : index
    %15 = vector.load %arg6[%c0_5, %c0_6] : memref<16x32xf32, #tpu.memory_space<vmem>>, vector<16x32xf32>
    %c0_7 = arith.constant 0 : index
    %c0_8 = arith.constant 0 : index
    %16 = vector.load %arg4[%c0_7, %c0_8] : memref<64x32xf32, #tpu.memory_space<vmem>>, vector<64x32xf32>
    %cst_9 = arith.constant dense<0.000000e+00> : vector<16x32xf32>
    %17 = tpu.matmul %14, %16, %cst_9 {dimension_numbers = #tpu.dot_dimension_numbers<[1], [0], [0], [1], [0, 0, 1, 1], [], []>} : vector<16x64xf32>, vector<64x32xf32>, vector<16x32xf32> -> vector<16x32xf32>
    %18 = arith.addf %15, %17 : vector<16x32xf32>
    %c0_10 = arith.constant 0 : index
    %c0_11 = arith.constant 0 : index
    %19 = vector.load %arg6[%c0_10, %c0_11] : memref<16x32xf32, #tpu.memory_space<vmem>>, vector<16x32xf32>
    tpu.vector_store %arg6[%c0_10, %c0_11], %18 {strides = array<i32>} : memref<16x32xf32, #tpu.memory_space<vmem>>, vector<16x32xf32>,
    %c0_i32_12 = arith.constant 0 : i32
    %20 = arith.cmpi eq, %arg1, %c0_i32_12 : i32
    %21 = arith.extui %20 : i1 to i32
    %c0_i32_13 = arith.constant 0 : i32
    %22 = arith.cmpi ne, %21, %c0_i32_13 : i32
    scf.if %22 {
      %c0_14 = arith.constant 0 : index
      %c0_15 = arith.constant 0 : index
      %23 = vector.load %arg6[%c0_14, %c0_15] : memref<16x32xf32, #tpu.memory_space<vmem>>, vector<16x32xf32>
      %c0_16 = arith.constant 0 : index
      %c0_17 = arith.constant 0 : index
      %24 = vector.load %arg5[%c0_16, %c0_17] : memref<16x32xf32, #tpu.memory_space<vmem>>, vector<16x32xf32>
      tpu.vector_store %arg5[%c0_16, %c0_17], %23 {strides = array<i32>} : memref<16x32xf32, #tpu.memory_space<vmem>>, vector<16x32xf32>,
    } else {
    }
    return
  }
  func.func @transform_0(%arg0: i32, %arg1: i32) -> (i32, i32) {
    %c0_i32 = arith.constant 0 : i32
    %c0_i32_0 = arith.constant 0 : i32
    return %arg0, %c0_i32 : i32, i32
  }
  func.func @transform_1(%arg0: i32, %arg1: i32) -> (i32, i32) {
    %c0_i32 = arith.constant 0 : i32
    %c0_i32_0 = arith.constant 0 : i32
    return %c0_i32, %arg1 : i32, i32
  }
  func.func @transform_2(%arg0: i32, %arg1: i32) -> (i32, i32) {
    %c0_i32 = arith.constant 0 : i32
    %c0_i32_0 = arith.constant 0 : i32
    return %arg1, %c0_i32 : i32, i32
  }
  func.func @transform_3(%arg0: i32, %arg1: i32) -> (i32, i32) {
    %c0_i32 = arith.constant 0 : i32
    %c0_i32_0 = arith.constant 0 : i32
    return %arg0, %c0_i32 : i32, i32
  }
}

</mosaic_0001>

<bundles_post_ra>
// kernel: qwen_mlp.1
= control target key start
LH: loop header
LB: loop body
LE: loop exit
PB: predicated region body
PF: predicated region fallthrough
CT: control target
= control target key end

     0   :  { %vm19_vm0 = vcmask 261120   ;;  %s461_s0 = inlined_call_operand.vmem [shape: f32[16,32], index: 0, kind: input, shape index: {}]   ;;  %s462_s1 = inlined_call_operand.vmem [shape: f32[32,128], index: 1, kind: input, shape index: {}]   ;;  %s463_s2 = inlined_call_operand.vmem [shape: f32[64,32], index: 2, kind: input, shape index: {}]   ;;  %s464_s3 = inlined_call_operand.hbm [shape: f32[16,32], index: 3, kind: output, shape index: {}]  }
   0x1   :  { %v24_v0 = vld [vmem:[%s462_s1] sm:$0xff]  ;;  %v25_v1 = vld [vmem:[%s462_s1 + $0x8] sm:$0xff]  ;;  %v26_v2 = vld [vmem:[%s462_s1 + $0x10] sm:$0xff] }
   0x2   :  { %v313_v3 = vpack.c.bf16 %v25_v1, %v24_v0  ;;  %v27_v4 = vld [vmem:[%s462_s1 + $0x18] sm:$0xff]  ;;  %v22_v5 = vld [vmem:[%s461_s0] sm:$0xff] }
   0x3   :  { %v317_v6 = vpack.c.bf16 %v27_v4, %v26_v2  ;;  %291 = vmatprep.mubr.msk.f32.mxu0 %vm19_vm0, %v22_v5 }
   0x4   :  { %8 = vsyncpa [#allocation4], 0  ;;  %314 = vmatprep.subr.bf16.mxu0 %v313_v3  ;;  %v23_v7 = vld [vmem:[%s461_s0 + $0x8] sm:$0xff]  ;;  %v144_v8 = vld [vmem:[%s463_s2] sm:$0xff]  ;;  %s374_s7 = smov 64   ;;  %v375_v28 = vmov 0.0  }
   0x5   :  { %316 = vmatpush3.bf16.msra.mxu0 %v313_v3  ;;  %v145_v9 = vld [vmem:[%s463_s2 + $0x8] sm:$0xff]  ;;  %v146_v10 = vld [vmem:[%s463_s2 + $0x10] sm:$0xff]  ;;  %v147_v12 = vld [vmem:[%s463_s2 + $0x18] sm:$0xff]  ;;  %21 = vst.msk [vmem:[#allocation2 + $0x8] sm:$0xff] %vm19_vm0, %v375_v28  ;;  %vm152_vm1 = vcmask 523264  }
   0x6   :  { %318 = vmatprep.subr.bf16.mxu0 %v317_v6  ;;  %v321_v11 = vpack.c.bf16 %v145_v9, %v144_v8  ;;  %v325_v13 = vpack.c.bf16 %v147_v12, %v146_v10  ;;  %v148_v14 = vld [vmem:[%s463_s2 + $0x20] sm:$0xff]  ;;  %v149_v15 = vld [vmem:[%s463_s2 + $0x28] sm:$0xff]  ;;  %v150_v23 = vld [vmem:[%s463_s2 + $0x30] sm:$0xff]  ;;  %20 = vst.msk [vmem:[#allocation2] sm:$0xff] %vm19_vm0, %v375_v28 }
   0x7   :  { %v329_v16 = vpack.c.bf16 %v149_v15, %v148_v14  ;;  %v151_v24 = vld [vmem:[%s463_s2 + $0x38] sm:$0xff]  ;;  %s376_s2 = smov [#allocation3]  }
   0x8   :  { %322 = vmatprep.subr.bf16.mxu1 %v321_v11  ;;  %v333_v26 = vpack.c.bf16 %v151_v24, %v150_v23  ;;  %s250_s12 = sshll.u32 %s376_s2, 4  ;;  %s251_s12 = int_to_ptr.vmem [resolvable:$true] %s250_s12 }
   0x9   :  { %320 = vmatpush3.bf16.msra.mxu0 %v317_v6  ;;  %324 = vmatpush3.bf16.msra.mxu1 %v321_v11  ;;  %s350_s13 = scalar_lea.vmem %s251_s12, 256  ;;  %p355_p1 = scmp.lt.s32.totalorder %s251_s12, %s251_s12 }
   0xa   :  { %326 = vmatprep.subr.bf16.mxu1 %v325_v13  ;;  %p351_p0 = scmp.ne.s32.totalorder %s251_s12, %s350_s13  ;;  %p356_p2 = scmp.lt.s32.totalorder %s350_s13, %s350_s13 }
   0xc   :  { %292 = vmatmul.mubr.msk.f32.vlgmr.msra.gmra.mrb[0].mxu0 %vm19_vm0, %v23_v7  ;;  %v143_v39 = vld [vmem:[#allocation2 + $0x8] sm:$0xff]  ;;  %p357_p3 = por %p356_p2, %p355_p1 }
   0xd   :  { %328 = vmatpush3.bf16.msra.mxu1 %v325_v13  ;;  %v142_v40 = vld [vmem:[#allocation2] sm:$0xff] }
   0xe   :  { %330 = vmatprep.subr.bf16.mxu1 %v329_v16  ;;  %p358_p4 = pnand %p357_p3, %p351_p0 }
  0x11   :  { %332 = vmatpush3.bf16.msra.mxu1 %v329_v16 }
  0x12   :  { %334 = vmatprep.subr.bf16.mxu1 %v333_v26 }
  0x15   :  { %336 = vmatpush3.bf16.msra.mxu1 %v333_v26 }
  0xdf   :  { %v293_v17 = vpop.f32.mrb[0].mxu0 }
  0xe0   :  { %v264_v18 = vmul.f32 -1.442695, %v293_v17  ;;  %v101_v19 = vpop.f32.mrb[1].mxu0 }
  0xe1   :  { %v263_v20 = vmul.f32 -1.442695, %v101_v19  ;;  %112 = vrot.lane.b32.xlu0 %v101_v19, %s374_s7 }
  0xe2   :  { %342 = vpow2.f32 %v264_v18 }
  0xe3   :  { %344 = vpow2.f32 %v263_v20 }
  0xe5   :  { %114 = vrot.lane.b32.xlu0 %v293_v17, %s374_s7 }
  0xec   :  { %v343_v21 = vpop.eup %342 }
  0xed   :  { %v345_v22 = vpop.eup %344  ;;  %v127_v27 = vadd.f32 1.0, %v343_v21 }
  0xee   :  { %v126_v25 = vadd.f32 1.0, %v345_v22 }
  0xf0   :  { %346 = vrcp.f32 %v126_v25 }
  0xf1   :  { %348 = vrcp.f32 %v127_v27 }
  0xfa   :  { %v347_v29 = vpop.eup %346 }
  0xfb   :  { %134 = vrot.lane.b32.xlu1 %v347_v29, %s374_s7  ;;  %v349_v30 = vpop.eup %348 }
  0xff   :  { %136 = vrot.lane.b32.xlu1 %v349_v30, %s374_s7 }
 0x153   :  { %v113_v31 = vpop.permute.xlu0 %112 }
 0x154   :  { %v118_v32 = vmul.f32 %v113_v31, %v101_v19 }
 0x157   :  { %v115_v33 = vpop.permute.xlu0 %114 }
 0x158   :  { %v119_v36 = vmul.f32 %v293_v17, %v115_v33 }
 0x16d   :  { %v135_v34 = vpop.permute.xlu1 %134 }
 0x16e   :  { %v140_v35 = vmul.f32 %v135_v34, %v118_v32 }
 0x170   :  { %310 = vmatprep.mubr.msk.f32.mxu1 %vm152_vm1, %v140_v35 }
 0x171   :  { %v137_v37 = vpop.permute.xlu1 %136 }
 0x172   :  { %v141_v38 = vmul.f32 %v137_v37, %v119_v36 }
 0x174   :  { %311 = vmatmul.mubr.msk.f32.vlgmr.msra.gmra.mrb[0].mxu1 %vm152_vm1, %v141_v38 }
 0x247   :  { %v312_v41 = vpop.f32.mrb[0].mxu1 }
 0x248   :  { %v235_v42 = vadd.f32 %v312_v41, %v143_v39  ;;  %v225_v43 = vpop.f32.mrb[1].mxu1 }
 0x249   :  { %v234_v44 = vadd.f32 %v225_v43, %v142_v40 }
 0x24a   :  { %237 = vst.msk [vmem:[#allocation2 + $0x8] sm:$0xff] %vm19_vm0, %v235_v42 }
 0x24b   :  { %236 = vst.msk [vmem:[#allocation2] sm:$0xff] %vm19_vm0, %v234_v44 }
 0x251   :  { %v242_v45 = vld [vmem:[#allocation2 + $0x8] sm:$0xff] }
 0x252   :  { %v241_v46 = vld [vmem:[#allocation2] sm:$0xff]  ;;  %244 = vst.msk [vmem:[#allocation3 + $0x8] sm:$0xff] %vm19_vm0, %v242_v45 }
 0x253   :  { %243 = vst.msk [vmem:[#allocation3] sm:$0xff] %vm19_vm0, %v241_v46 }
 0x254   :  { %361 = shalt.err (!%p358_p4)
}
 0x255   :  { %s362_s16 = scalar_lea.hbm %s464_s3, 256 }
 0x256   :  { %p363_p5 = scmp.ne.s32.totalorder %s464_s3, %s362_s16  ;;  %p366_p6 = scmp.lt.u32.totalorder %s362_s16, %s464_s3 }
 0x258   :  { %p368_p7 = pnand %p366_p6, %p363_p5 }
 0x25a   :  { %371 = shalt.err (!%p368_p7)
}
 0x25b   :  { %s377_s21 = smov 128   ;;  %s378_s22 = smov 8  }
 0x25c   :  { %256 = dma.vmem_to_hbm [thread:$0]  %s251_s12, 256, %s464_s3, [#allocation4], %s377_s21, %s377_s21, %s378_s22  }
 0x25d   :  { %372 = dma.done.wait [#allocation4], 256  }
 0x25e   :  { %373 = vsyncadd [#allocation4], 4294967040 }
 0x25f   :  { %260 = vsyncpa [#allocation4], 1 }

</bundles_post_ra>
